<compile_context>
chip_gen: v7x
topology: tpu7x:2x2x1
jax: 0.10.0
libtpu: 0.0.40
codegen_flags: <defaults>
</compile_context>

<pallas_src>
import jax
import jax.numpy as jnp
from jax.experimental import pallas as pl
from jax.experimental.pallas import tpu as pltpu


# ---------------------------------------------------------------------------
# Kernel 1: streaming max-pool over lane-dense (TR, L) row tiles.
# ---------------------------------------------------------------------------
def _make_pool_kernel(n_h: int, W: int, kh: int, kw: int):
    """Each flat row holds n_h valid H-rows of width W (row length L = n_h*W).
    Produces ceil(n_h/kh) * ceil(W/kw) pooled values per row."""
    hp = -(-n_h // kh)
    wp = -(-W // kw)

    def pool_one(x_ref, o_ref):
        cols = []
        for ph in range(hp):
            h0 = ph * kh
            hh = min(kh, n_h - h0)                 # ceil_mode: short last window
            rowmax = x_ref[0, :, h0 * W:(h0 + 1) * W]            # (TR, W)
            for i in range(1, hh):
                rowmax = jnp.maximum(
                    rowmax, x_ref[0, :, (h0 + i) * W:(h0 + i + 1) * W])
            for pw in range(wp):
                w0 = pw * kw
                ww = min(kw, W - w0)               # ceil_mode: short last window
                seg = rowmax[:, w0:w0 + ww]
                cols.append(jnp.max(seg, axis=1, keepdims=True))  # (TR, 1)
        out = cols[0] if len(cols) == 1 else jnp.concatenate(cols, axis=1)
        o_ref[0] = out                             # ONE store per input per tile

    def kernel(s_ref, t_ref, ps_ref, pt_ref):
        pool_one(s_ref, ps_ref)
        pool_one(t_ref, pt_ref)

    return kernel


# ---------------------------------------------------------------------------
# Kernel 2: per-item cosine-similarity Gram + squared-error loss.
# ---------------------------------------------------------------------------
def _make_sim_loss_kernel(B: int, M: int, C: int):
    inv_denom = 1.0 / (float(M) * float(M) * float(B))
    use_mxu = M >= 8   # tiny Grams: fused VPU broadcast-reduce, no degenerate matmul

    def gram(g):       # g: (B, M, C) f32, contraction over channels C
        if use_mxu:
            return jnp.einsum('bmc,bnc->bmn', g, g,
                              preferred_element_type=jnp.float32,
                              precision=jax.lax.Precision.HIGHEST)
        return jnp.sum(g[:, :, None, :] * g[:, None, :, :], axis=-1)

    def kernel(ps_ref, pt_ref, loss_ref):
        fS = ps_ref[0].astype(jnp.float32)         # (B, M, C)
        fT = pt_ref[0].astype(jnp.float32)
        gS = fS / (jnp.sqrt(jnp.sum(fS * fS, axis=-1, keepdims=True)) + 1e-8)
        gT = fT / (jnp.sqrt(jnp.sum(fT * fT, axis=-1, keepdims=True)) + 1e-8)
        d = gram(gT) - gram(gS)
        loss_ref[...] = jnp.broadcast_to(jnp.sum(d * d) * inv_denom, (1, 1, 128))

    return kernel


# ---------------------------------------------------------------------------
# Forward-pass wrapper.
# ---------------------------------------------------------------------------
def criterion_pairwise_whole_feat_after_pool(preds_Ss, preds_Ts, scale=1.0,
                                             tile_bytes=2 * 1024 * 1024):
    """preds_Ss / preds_Ts: (N, B, C, H, W) arrays or length-N lists of equally
    shaped (B, C, H, W) student / teacher feature maps.  Returns scalar loss."""
    if isinstance(preds_Ss, (list, tuple)):
        preds_S = jnp.stack([jnp.asarray(p) for p in preds_Ss])
        preds_T = jnp.stack([jnp.asarray(p) for p in preds_Ts])
    else:
        preds_S = jnp.asarray(preds_Ss)
        preds_T = jnp.asarray(preds_Ts)
    # TODO(synk): items with heterogeneous (B, C, H, W) shapes would need one
    # specialized pallas_call per item instead of the stacked N axis.
    assert preds_S.shape == preds_T.shape and preds_S.ndim == 5
    assert preds_S.dtype == preds_T.dtype
    N, B, C, H, W = preds_T.shape

    kh = int(H * scale)
    kw = int(W * scale)
    assert kh >= 1 and kw >= 1, "scale too small for the spatial dims"
    Hp = -(-H // kh)                  # MaxPool2d ceil_mode output sizes
    Wp = -(-W // kw)
    M = Hp * Wp

    # ---- layout for kernel 1 (free reshapes only, never pad HBM) ----
    if H % kh == 0:
        n_h, R, P = kh, B * C * Hp, Wp        # one kh x W window-strip per row
    else:
        n_h, R, P = H, B * C, M               # whole (H, W) map per row
    L = n_h * W
    xs = preds_S.reshape(N, R, L)
    xt = preds_T.reshape(N, R, L)

    # ---- row-tile size from the TRUE (lane/sublane padded) VMEM footprint ----
    itemsize = jnp.dtype(preds_T.dtype).itemsize
    sub = 8 if itemsize >= 4 else (16 if itemsize == 2 else 32)
    row_bytes = -(-L // 128) * 128 * itemsize
    target_rows = max(1, tile_bytes // row_bytes)
    if target_rows >= R:
        TR = R
    else:
        TR = max(sub, (target_rows // sub) * sub)
    n_r = pl.cdiv(R, TR)                      # ragged last tile: OOB writes dropped

    out_row_bytes = -(-P // 128) * 128 * itemsize
    tile_rows_pad = -(-TR // sub) * sub
    resident = 4 * tile_rows_pad * (row_bytes + out_row_bytes)  # 2 arrays x 2 bufs
    vmem_limit = None
    if resident > 14 * 1024 * 1024:
        # Only for very large single rows (huge H*W in the ragged-H path).
        # TODO(synk): shapes whose minimum tile exceeds ~60 MiB cannot fit v7x VMEM.
        vmem_limit = min(resident + (4 << 20), 60 * 1024 * 1024)

    pooled_S, pooled_T = pl.pallas_call(
        _make_pool_kernel(n_h, W, kh, kw),
        out_shape=(jax.ShapeDtypeStruct((N, R, P), preds_S.dtype),
                   jax.ShapeDtypeStruct((N, R, P), preds_T.dtype)),
        grid=(N, n_r),
        in_specs=[
            pl.BlockSpec((1, TR, L), lambda n, r: (n, r, 0)),
            pl.BlockSpec((1, TR, L), lambda n, r: (n, r, 0)),
        ],
        out_specs=(
            pl.BlockSpec((1, TR, P), lambda n, r: (n, r, 0)),
            pl.BlockSpec((1, TR, P), lambda n, r: (n, r, 0)),
        ),
        compiler_params=pltpu.CompilerParams(
            dimension_semantics=("parallel", "parallel"),
            vmem_limit_bytes=vmem_limit),
    )(xs, xt)

    # Pooled tensors are tiny: this reshape/transpose to a channel-minor layout
    # for kernel 2 is noise next to the kernel-1 stream.
    def _to_bmc(p):
        return p.reshape(N, B, C, M).transpose(0, 1, 3, 2)   # (N, B, M, C)

    per_item = pl.pallas_call(
        _make_sim_loss_kernel(B, M, C),
        out_shape=jax.ShapeDtypeStruct((N, 1, 128), jnp.float32),
        grid=(N,),
        in_specs=[
            pl.BlockSpec((1, B, M, C), lambda n: (n, 0, 0, 0)),
            pl.BlockSpec((1, B, M, C), lambda n: (n, 0, 0, 0)),
        ],
        out_specs=pl.BlockSpec((1, 1, 128), lambda n: (n, 0, 0)),
        compiler_params=pltpu.CompilerParams(
            dimension_semantics=("parallel",)),
    )(_to_bmc(pooled_S), _to_bmc(pooled_T))

    return jnp.sum(per_item[:, 0, 0])


# ---------------------------------------------------------------------------
# Pure-JAX reference mirroring the PyTorch module.
# ---------------------------------------------------------------------------
def _ref_maxpool(x, kh, kw):
    B, C, H, W = x.shape
    Hp = -(-H // kh)
    Wp = -(-W // kw)
    xp = jnp.pad(x, ((0, 0), (0, 0), (0, Hp * kh - H), (0, Wp * kw - W)),
                 constant_values=-jnp.inf)
    return xp.reshape(B, C, Hp, kh, Wp, kw).max(axis=(3, 5))


def _ref_similarity(feat):
    feat = feat.astype(jnp.float32)
    norm = jnp.sqrt(jnp.sum(feat ** 2, axis=1, keepdims=True)) + 1e-8
    f = (feat / norm).reshape(feat.shape[0], feat.shape[1], -1)
    return jnp.einsum('icm,icn->imn', f, f,
                      precision=jax.lax.Precision.HIGHEST)


def _ref_sim_dis(f_S, f_T):
    err = (_ref_similarity(f_T) - _ref_similarity(f_S)) ** 2
    return jnp.sum(err) / (f_T.shape[-1] * f_T.shape[-2]) ** 2 / f_T.shape[0]


def criterion_pairwise_ref(preds_Ss, preds_Ts, scale=1.0):
    loss_all = 0.0
    for s, t in zip(preds_Ss, preds_Ts):
        kh = int(t.shape[2] * scale)
        kw = int(t.shape[3] * scale)
        loss_all = loss_all + _ref_sim_dis(_ref_maxpool(s, kh, kw),
                                           _ref_maxpool(t, kh, kw))
    return loss_all


if __name__ == "__main__":
    key = jax.random.PRNGKey(0)
    k1, k2, k3, k4 = jax.random.split(key, 4)

    # N=3 feature-map pairs (multi-layer distillation), each (B=2, C=4, 16, 16)
    N, B, C, H, W = 3, 2, 4, 16, 16
    preds_S = jax.random.normal(k1, (N, B, C, H, W), dtype=jnp.float32)
    preds_T = jax.random.normal(k2, (N, B, C, H, W), dtype=jnp.float32)
    s_list = [preds_S[i] for i in range(N)]
    t_list = [preds_T[i] for i in range(N)]

    # scale=0.5: 8x8 windows -> 2x2 pooled grid (M=4); divisible fast path.
    loss_half = criterion_pairwise_whole_feat_after_pool(s_list, t_list, scale=0.5)
    jax.block_until_ready(loss_half)
    ref_half = criterion_pairwise_ref(s_list, t_list, scale=0.5)
    assert jnp.allclose(loss_half, ref_half, rtol=1e-4, atol=1e-6), (loss_half, ref_half)

    # module default scale=1: single 16x16 window (M=1, loss ~0 by construction).
    loss_one = criterion_pairwise_whole_feat_after_pool(s_list, t_list, scale=1.0)
    jax.block_until_ready(loss_one)
    ref_one = criterion_pairwise_ref(s_list, t_list, scale=1.0)
    assert jnp.allclose(loss_one, ref_one, rtol=1e-4, atol=1e-6), (loss_one, ref_one)

    # ceil_mode ragged case: 10x10 maps, scale=0.4 -> 4x4 windows -> 3x3 pooled
    # grid with short last windows, handled in-kernel (no -inf pre-padding).
    Nr, Br, Cr, Hr, Wr = 2, 2, 4, 10, 10
    rs = jax.random.normal(k3, (Nr, Br, Cr, Hr, Wr), dtype=jnp.float32)
    rt = jax.random.normal(k4, (Nr, Br, Cr, Hr, Wr), dtype=jnp.float32)
    loss_rag = criterion_pairwise_whole_feat_after_pool(rs, rt, scale=0.4)
    jax.block_until_ready(loss_rag)
    ref_rag = criterion_pairwise_ref([rs[i] for i in range(Nr)],
                                     [rt[i] for i in range(Nr)], scale=0.4)
    assert jnp.allclose(loss_rag, ref_rag, rtol=1e-4, atol=1e-6), (loss_rag, ref_rag)

    print("KERNEL_OK")
</pallas_src>

<mosaic_0001>
module attributes {stable_mosaic.version = 11 : i64} {
  func.func @kernel(%arg0: i32, %arg1: i32, %arg2: memref<1x16x128xf32, #tpu.memory_space<vmem>>, %arg3: memref<1x16x128xf32, #tpu.memory_space<vmem>>, %arg4: memref<1x16x2xf32, #tpu.memory_space<vmem>>, %arg5: memref<1x16x2xf32, #tpu.memory_space<vmem>>) attributes {dimension_semantics = [#tpu.dimension_semantics<parallel>, #tpu.dimension_semantics<parallel>], iteration_bounds = array<i64: 3, 1>, scalar_prefetch = 0 : i64, scratch_operands = 0 : i64, tpu.core_type = #tpu.core_type<tc>, window_params = [{transform_indices = @transform_0, window_bounds = array<i64: 1, 16, 128>}, {transform_indices = @transform_1, window_bounds = array<i64: 1, 16, 128>}, {transform_indices = @transform_2, window_bounds = array<i64: 1, 16, 2>}, {transform_indices = @transform_3, window_bounds = array<i64: 1, 16, 2>}]} {
    %c0 = arith.constant 0 : index
    %c0_0 = arith.constant 0 : index
    %c0_1 = arith.constant 0 : index
    %0 = vector.load %arg2[%c0, %c0_0, %c0_1] : memref<1x16x128xf32, #tpu.memory_space<vmem>>, vector<1x16x16xf32>
    %1 = vector.shape_cast %0 : vector<1x16x16xf32> to vector<16x16xf32>
    %c0_2 = arith.constant 0 : index
    %c0_3 = arith.constant 0 : index
    %c16 = arith.constant 16 : index
    %2 = vector.load %arg2[%c0_2, %c0_3, %c16] : memref<1x16x128xf32, #tpu.memory_space<vmem>>, vector<1x16x16xf32>
    %3 = vector.shape_cast %2 : vector<1x16x16xf32> to vector<16x16xf32>
    %4 = arith.maximumf %1, %3 : vector<16x16xf32>
    %c0_4 = arith.constant 0 : index
    %c0_5 = arith.constant 0 : index
    %c32 = arith.constant 32 : index
    %5 = vector.load %arg2[%c0_4, %c0_5, %c32] : memref<1x16x128xf32, #tpu.memory_space<vmem>>, vector<1x16x16xf32>
    %6 = vector.shape_cast %5 : vector<1x16x16xf32> to vector<16x16xf32>
    %7 = arith.maximumf %4, %6 : vector<16x16xf32>
    %c0_6 = arith.constant 0 : index
    %c0_7 = arith.constant 0 : index
    %c48 = arith.constant 48 : index
    %8 = vector.load %arg2[%c0_6, %c0_7, %c48] : memref<1x16x128xf32, #tpu.memory_space<vmem>>, vector<1x16x16xf32>
    %9 = vector.shape_cast %8 : vector<1x16x16xf32> to vector<16x16xf32>
    %10 = arith.maximumf %7, %9 : vector<16x16xf32>
    %c0_8 = arith.constant 0 : index
    %c0_9 = arith.constant 0 : index
    %c64 = arith.constant 64 : index
    %11 = vector.load %arg2[%c0_8, %c0_9, %c64] : memref<1x16x128xf32, #tpu.memory_space<vmem>>, vector<1x16x16xf32>
    %12 = vector.shape_cast %11 : vector<1x16x16xf32> to vector<16x16xf32>
    %13 = arith.maximumf %10, %12 : vector<16x16xf32>
    %c0_10 = arith.constant 0 : index
    %c0_11 = arith.constant 0 : index
    %c80 = arith.constant 80 : index
    %14 = vector.load %arg2[%c0_10, %c0_11, %c80] : memref<1x16x128xf32, #tpu.memory_space<vmem>>, vector<1x16x16xf32>
    %15 = vector.shape_cast %14 : vector<1x16x16xf32> to vector<16x16xf32>
    %16 = arith.maximumf %13, %15 : vector<16x16xf32>
    %c0_12 = arith.constant 0 : index
    %c0_13 = arith.constant 0 : index
    %c96 = arith.constant 96 : index
    %17 = vector.load %arg2[%c0_12, %c0_13, %c96] : memref<1x16x128xf32, #tpu.memory_space<vmem>>, vector<1x16x16xf32>
    %18 = vector.shape_cast %17 : vector<1x16x16xf32> to vector<16x16xf32>
    %19 = arith.maximumf %16, %18 : vector<16x16xf32>
    %c0_14 = arith.constant 0 : index
    %c0_15 = arith.constant 0 : index
    %c112 = arith.constant 112 : index
    %20 = vector.load %arg2[%c0_14, %c0_15, %c112] : memref<1x16x128xf32, #tpu.memory_space<vmem>>, vector<1x16x16xf32>
    %21 = vector.shape_cast %20 : vector<1x16x16xf32> to vector<16x16xf32>
    %22 = arith.maximumf %19, %21 : vector<16x16xf32>
    %23 = vector.extract_strided_slice %22 {offsets = [0, 0], sizes = [16, 8], strides = [1, 1]} : vector<16x16xf32> to vector<16x8xf32>
    %cst = arith.constant dense<0xFF800000> : vector<16xf32>
    %24 = vector.multi_reduction <maximumf>, %23, %cst [1] : vector<16x8xf32> to vector<16xf32>
    %25 = vector.shape_cast %24 : vector<16xf32> to vector<16x1xf32>
    %26 = vector.extract_strided_slice %22 {offsets = [0, 8], sizes = [16, 8], strides = [1, 1]} : vector<16x16xf32> to vector<16x8xf32>
    %cst_16 = arith.constant dense<0xFF800000> : vector<16xf32>
    %27 = vector.multi_reduction <maximumf>, %26, %cst_16 [1] : vector<16x8xf32> to vector<16xf32>
    %28 = vector.shape_cast %27 : vector<16xf32> to vector<16x1xf32>
    %29 = tpu.concatenate %25, %28 in 1 : vector<16x1xf32>, vector<16x1xf32> -> vector<16x2xf32>
    %c0_17 = arith.constant 0 : index
    %c0_18 = arith.constant 0 : index
    %c0_19 = arith.constant 0 : index
    %30 = vector.load %arg4[%c0_17, %c0_18, %c0_19] : memref<1x16x2xf32, #tpu.memory_space<vmem>>, vector<1x16x2xf32>
    %31 = vector.shape_cast %30 : vector<1x16x2xf32> to vector<16x2xf32>
    %32 = vector.shape_cast %29 : vector<16x2xf32> to vector<1x16x2xf32>
    tpu.vector_store %arg4[%c0_17, %c0_18, %c0_19], %32 {strides = array<i32>} : memref<1x16x2xf32, #tpu.memory_space<vmem>>, vector<1x16x2xf32>,
    %c0_20 = arith.constant 0 : index
    %c0_21 = arith.constant 0 : index
    %c0_22 = arith.constant 0 : index
    %33 = vector.load %arg3[%c0_20, %c0_21, %c0_22] : memref<1x16x128xf32, #tpu.memory_space<vmem>>, vector<1x16x16xf32>
    %34 = vector.shape_cast %33 : vector<1x16x16xf32> to vector<16x16xf32>
    %c0_23 = arith.constant 0 : index
    %c0_24 = arith.constant 0 : index
    %c16_25 = arith.constant 16 : index
    %35 = vector.load %arg3[%c0_23, %c0_24, %c16_25] : memref<1x16x128xf32, #tpu.memory_space<vmem>>, vector<1x16x16xf32>
    %36 = vector.shape_cast %35 : vector<1x16x16xf32> to vector<16x16xf32>
    %37 = arith.maximumf %34, %36 : vector<16x16xf32>
    %c0_26 = arith.constant 0 : index
    %c0_27 = arith.constant 0 : index
    %c32_28 = arith.constant 32 : index
    %38 = vector.load %arg3[%c0_26, %c0_27, %c32_28] : memref<1x16x128xf32, #tpu.memory_space<vmem>>, vector<1x16x16xf32>
    %39 = vector.shape_cast %38 : vector<1x16x16xf32> to vector<16x16xf32>
    %40 = arith.maximumf %37, %39 : vector<16x16xf32>
    %c0_29 = arith.constant 0 : index
    %c0_30 = arith.constant 0 : index
    %c48_31 = arith.constant 48 : index
    %41 = vector.load %arg3[%c0_29, %c0_30, %c48_31] : memref<1x16x128xf32, #tpu.memory_space<vmem>>, vector<1x16x16xf32>
    %42 = vector.shape_cast %41 : vector<1x16x16xf32> to vector<16x16xf32>
    %43 = arith.maximumf %40, %42 : vector<16x16xf32>
    %c0_32 = arith.constant 0 : index
    %c0_33 = arith.constant 0 : index
    %c64_34 = arith.constant 64 : index
    %44 = vector.load %arg3[%c0_32, %c0_33, %c64_34] : memref<1x16x128xf32, #tpu.memory_space<vmem>>, vector<1x16x16xf32>
    %45 = vector.shape_cast %44 : vector<1x16x16xf32> to vector<16x16xf32>
    %46 = arith.maximumf %43, %45 : vector<16x16xf32>
    %c0_35 = arith.constant 0 : index
    %c0_36 = arith.constant 0 : index
    %c80_37 = arith.constant 80 : index
    %47 = vector.load %arg3[%c0_35, %c0_36, %c80_37] : memref<1x16x128xf32, #tpu.memory_space<vmem>>, vector<1x16x16xf32>
    %48 = vector.shape_cast %47 : vector<1x16x16xf32> to vector<16x16xf32>
    %49 = arith.maximumf %46, %48 : vector<16x16xf32>
    %c0_38 = arith.constant 0 : index
    %c0_39 = arith.constant 0 : index
    %c96_40 = arith.constant 96 : index
    %50 = vector.load %arg3[%c0_38, %c0_39, %c96_40] : memref<1x16x128xf32, #tpu.memory_space<vmem>>, vector<1x16x16xf32>
    %51 = vector.shape_cast %50 : vector<1x16x16xf32> to vector<16x16xf32>
    %52 = arith.maximumf %49, %51 : vector<16x16xf32>
    %c0_41 = arith.constant 0 : index
    %c0_42 = arith.constant 0 : index
    %c112_43 = arith.constant 112 : index
    %53 = vector.load %arg3[%c0_41, %c0_42, %c112_43] : memref<1x16x128xf32, #tpu.memory_space<vmem>>, vector<1x16x16xf32>
    %54 = vector.shape_cast %53 : vector<1x16x16xf32> to vector<16x16xf32>
    %55 = arith.maximumf %52, %54 : vector<16x16xf32>
    %56 = vector.extract_strided_slice %55 {offsets = [0, 0], sizes = [16, 8], strides = [1, 1]} : vector<16x16xf32> to vector<16x8xf32>
    %cst_44 = arith.constant dense<0xFF800000> : vector<16xf32>
    %57 = vector.multi_reduction <maximumf>, %56, %cst_44 [1] : vector<16x8xf32> to vector<16xf32>
    %58 = vector.shape_cast %57 : vector<16xf32> to vector<16x1xf32>
    %59 = vector.extract_strided_slice %55 {offsets = [0, 8], sizes = [16, 8], strides = [1, 1]} : vector<16x16xf32> to vector<16x8xf32>
    %cst_45 = arith.constant dense<0xFF800000> : vector<16xf32>
    %60 = vector.multi_reduction <maximumf>, %59, %cst_45 [1] : vector<16x8xf32> to vector<16xf32>
    %61 = vector.shape_cast %60 : vector<16xf32> to vector<16x1xf32>
    %62 = tpu.concatenate %58, %61 in 1 : vector<16x1xf32>, vector<16x1xf32> -> vector<16x2xf32>
    %c0_46 = arith.constant 0 : index
    %c0_47 = arith.constant 0 : index
    %c0_48 = arith.constant 0 : index
    %63 = vector.load %arg5[%c0_46, %c0_47, %c0_48] : memref<1x16x2xf32, #tpu.memory_space<vmem>>, vector<1x16x2xf32>
    %64 = vector.shape_cast %63 : vector<1x16x2xf32> to vector<16x2xf32>
    %65 = vector.shape_cast %62 : vector<16x2xf32> to vector<1x16x2xf32>
    tpu.vector_store %arg5[%c0_46, %c0_47, %c0_48], %65 {strides = array<i32>} : memref<1x16x2xf32, #tpu.memory_space<vmem>>, vector<1x16x2xf32>,
    return
  }
  func.func @transform_0(%arg0: i32, %arg1: i32) -> (i32, i32, i32) {
    %c0_i32 = arith.constant 0 : i32
    %c0_i32_0 = arith.constant 0 : i32
    return %arg0, %arg1, %c0_i32 : i32, i32, i32
  }
  func.func @transform_1(%arg0: i32, %arg1: i32) -> (i32, i32, i32) {
    %c0_i32 = arith.constant 0 : i32
    %c0_i32_0 = arith.constant 0 : i32
    return %arg0, %arg1, %c0_i32 : i32, i32, i32
  }
  func.func @transform_2(%arg0: i32, %arg1: i32) -> (i32, i32, i32) {
    %c0_i32 = arith.constant 0 : i32
    %c0_i32_0 = arith.constant 0 : i32
    return %arg0, %arg1, %c0_i32 : i32, i32, i32
  }
  func.func @transform_3(%arg0: i32, %arg1: i32) -> (i32, i32, i32) {
    %c0_i32 = arith.constant 0 : i32
    %c0_i32_0 = arith.constant 0 : i32
    return %arg0, %arg1, %c0_i32 : i32, i32, i32
  }
}

</mosaic_0001>

<bundles_post_ra>
// kernel: tpu_custom_call.1
= control target key start
LH: loop header
LB: loop body
LE: loop exit
PB: predicated region body
PF: predicated region fallthrough
CT: control target
= control target key end

     0   :  { %9 = vsyncpa [#allocation3], 0  ;;  %s1073_s0 = inlined_call_operand.hbm [shape: f32[3,16,128], index: 0, kind: input, shape index: {}]   ;;  %s1074_s1 = inlined_call_operand.hbm [shape: f32[3,16,128], index: 1, kind: input, shape index: {}]   ;;  %s1075_s2 = inlined_call_operand.vmem [shape: f32[3,16,2], index: 2, kind: output, shape index: {0}]   ;;  %s1076_s3 = inlined_call_operand.vmem [shape: f32[3,16,2], index: 3, kind: output, shape index: {1}]  }
   0x1   :  { %11 = vsyncpa [#allocation3 + $0x1], 0 }
   0x2   :  { %12 = vsyncpa [#allocation5], 0 }
   0x3   :  { %14 = vsyncpa [#allocation5 + $0x1], 0  ;;  %s854_s12 = smov 0   ;;  %s856_s13 = smov 0  }
   0x4   :  { %s858_s14 = smov 0   ;;  %s860_s15 = smov 0  }
   0x5   :  { %s862_s16 = smov 0   ;;  %s864_s17 = smov 0  }
   0x6 LB: > { %s615_s18 = sadd.s32 4294967295, %s821_s17   ;;  %s32_s19 = sadd.s32 1, %s817_s16  ;;  %s821_s17 = sphi %s864_s17, %s20_s17   ;;  %s817_s16 = sphi %s862_s16, %s1087_s16   ;;  %s813_s15 = sphi %s860_s15, %s1086_s15   ;;  %s809_s14 = sphi %s858_s14, %s1085_s14   ;;  %s805_s13 = sphi %s856_s13, %s1084_s13   ;;  %s801_s12 = sphi %s854_s12, %s1083_s12  }
   0x7   : > { %p34_p0 = scmp.ge.s32.totalorder %s32_s19, 3  ;;  %s41_s20 = sadd.s32 1, %s809_s14 }
   0x8   : > { %p48_p1 = scmp.ne.s32.totalorder %s809_s14, %s805_s13  ;;  %p49_p2 = scmp.eq.s32.totalorder %s821_s17, 0 }
   0x9   : > { %s1089_s19 = smov (%p34_p0, %s32_s19), 0  ;;  %p54_p4 = scmp.ne.s32.totalorder %s805_s13, %s801_s12 }
   0xa   : > { %p890_p3 = por %p49_p2, %p48_p1  ;;  %s36_s22 = ssub.s32 %s817_s16, %s1089_s19 }
   0xb   : > { %p55_p5 = scmp.eq.s32.totalorder %s615_s18, 0  ;;  %p39_p6 = scmp.eq.s32.totalorder %s36_s22, 0 }
   0xc   : > { %p649_p8 = scmp.lt.s32.totalorder %s821_s17, 3  ;;  %s906_s25 = sand.u32 1, %s809_s14  }
   0xd   : > { %p897_p7 = por %p55_p5, %p54_p4  ;;  %s634_s26 = sshll.u32 %s817_s16, 8 }
   0xe   : > { %s903_s24 = scalar_select %p39_p6, %s809_s14, %s41_s20  }
   0xf   : > { %s1079_s23 = scalar_select %p897_p7, 1, 0 }
  0x10   : > { %s619_s27 = sshll.u32 %s906_s25, 4  ;;  %s915_s30 = scalar_lea.hbm %s1073_s0, %s634_s26 }
  0x11   : > { %s166_s4 = scalar_lea.vmem [#allocation2], %s619_s27  ;;  %p921_p9 = pnand %p649_p8, %p890_p3 }
  0x12   : > { %s175_s5 = sshll.u32 %s166_s4, 4  ;;  %s163_s7 = scalar_lea.sflag [#allocation3], %s906_s25  ;;  %s925_s5 = int_to_ptr.vmem [resolvable:$true] %s175_s5 }
  0x13   : > { %s707_s8 = scalar_lea.hbm %s915_s30, 256  ;;  %p709_p11 = pneg %p921_p9 }
  0x14   : > { %p708_p10 = scmp.ne.s32.totalorder %s915_s30, %s707_s8  ;;  %s712_s11 = scalar_lea.hbm %s1073_s0, 768 }
  0x15   : > { %p713_p0 = scmp.lt.u32.totalorder %s915_s30, %s1073_s0  ;;  %p714_p1 = scmp.lt.u32.totalorder %s712_s11, %s707_s8 }
  0x16   : > { %p710_p12 = pnand %p709_p11, %p708_p10  ;;  %p716_p3 = scmp.lt.u32.totalorder %s707_s8, %s915_s30 }
  0x17   : > { %p715_p2 = por %p714_p1, %p713_p0 }
  0x18   : > { %p711_p13 = pneg %p710_p12 }
  0x19   : > { %p717_p4 = por %p716_p3, %p715_p2 }
  0x1b   : > { %p718_p5 = pnand %p717_p4, %p711_p13 }
  0x1d   : > { %721 = shalt.err (!%p718_p5)
}
  0x1e   : > { %s722_s20 = scalar_lea.vmem %s925_s5, 256  ;;  %s823_s21 = smov [#allocation2]  }
  0x1f   : > { %p723_p6 = scmp.ne.s32.totalorder %s925_s5, %s722_s20  ;;  %s727_s22 = sshll.u32 %s823_s21, 4  ;;  %s728_s22 = int_to_ptr.vmem [resolvable:$false] %s727_s22 }
  0x20   : > { %s729_s28 = scalar_lea.vmem %s728_s22, 512  ;;  %p730_p12 = scmp.lt.s32.totalorder %s925_s5, %s728_s22 }
  0x21   : > { %p725_p8 = pnand %p723_p6, %p709_p11  ;;  %p731_p0 = scmp.lt.s32.totalorder %s729_s28, %s722_s20 }
  0x23   : > { %p726_p10 = pneg %p725_p8  ;;  %p732_p1 = por %p731_p0, %p730_p12 }
  0x25   : > { %p733_p2 = pnand %p732_p1, %p726_p10 }
  0x27   : > { %736 = shalt.err (!%p733_p2)
}
  0x28   : > { %s824_s29 = smov 128   ;;  %s825_s4 = smov 8  }
  0x29   : > { %645 = dma.hbm_to_vmem [thread:$0]  (!%p921_p9), %s915_s30, 256, %s925_s5, %s163_s7, %s824_s29, %s824_s29, %s825_s4  }
  0x2a   : > { %p625_p13 = scmp.ge.s32.totalorder %s821_s17, 1  ;;  %p206_p3 = scmp.lt.s32.totalorder %s821_s17, 4 }
  0x2b   : > { %s969_s11 = scalar_lea.hbm %s1074_s1, %s634_s26  ;;  %s189_s12 = scalar_lea.vmem [#allocation4], %s619_s27 }
  0x2c   : > { %p960_p4 = pnand %p625_p13, %p206_p3  ;;  %s198_s18 = sshll.u32 %s189_s12, 4  ;;  %s973_s18 = int_to_ptr.vmem [resolvable:$true] %s198_s18 }
  0x2d   : > { %s186_s30 = scalar_lea.sflag [#allocation5], %s906_s25  ;;  %s737_s5 = scalar_lea.hbm %s969_s11, 256 }
  0x2e   : > { %p738_p5 = scmp.ne.s32.totalorder %s969_s11, %s737_s5  ;;  %s742_s26 = scalar_lea.hbm %s1074_s1, 768 }
  0x2f   : > { %p743_p10 = scmp.lt.u32.totalorder %s969_s11, %s1074_s1  ;;  %p744_p12 = scmp.lt.u32.totalorder %s742_s26, %s737_s5 }
  0x30   : > { %p740_p6 = pnand %p738_p5, %p709_p11  ;;  %p746_p1 = scmp.lt.u32.totalorder %s737_s5, %s969_s11 }
  0x31   : > { %p745_p0 = por %p744_p12, %p743_p10 }
  0x32   : > { %p741_p8 = pneg %p740_p6 }
  0x33   : > { %p747_p2 = por %p746_p1, %p745_p0 }
  0x35   : > { %p748_p13 = pnand %p747_p2, %p741_p8 }
  0x37   : > { %751 = shalt.err (!%p748_p13)
}
  0x38   : > { %s752_s27 = scalar_lea.vmem %s973_s18, 256  ;;  %s826_s28 = smov [#allocation4]  }
  0x39   : > { %p753_p3 = scmp.ne.s32.totalorder %s973_s18, %s752_s27  ;;  %s757_s9 = sshll.u32 %s826_s28, 4  ;;  %s758_s9 = int_to_ptr.vmem [resolvable:$false] %s757_s9 }
  0x3a   : > { %s759_s10 = scalar_lea.vmem %s758_s9, 512  ;;  %p760_p7 = scmp.lt.s32.totalorder %s973_s18, %s758_s9 }
  0x3b   : > { %p755_p5 = pnand %p753_p3, %p709_p11  ;;  %p761_p10 = scmp.lt.s32.totalorder %s759_s10, %s752_s27 }
  0x3d   : > { %p756_p6 = pneg %p755_p5  ;;  %p762_p12 = por %p761_p10, %p760_p7 }
  0x3f   : > { %p763_p0 = pnand %p762_p12, %p756_p6 }
  0x41   : > { %766 = shalt.err (!%p763_p0)
}
  0x42   : > { %648 = dma.hbm_to_vmem [thread:$0]  (!%p921_p9), %s969_s11, 256, %s973_s18, %s186_s30, %s824_s29, %s824_s29, %s825_s4  }
  0x43   : > { %210 = sbr.rel (%p960_p4) target bundleno = 405 (0x195), region = 28  ;;  %s212_s12 = sand.u32 (!%p960_p4), 1, %s805_s13  }
  0x44   : > { %s626_s5 = sshll.u32 (!%p960_p4), %s212_s12, 4  ;;  %s213_s7 = scalar_lea.sflag (!%p960_p4), [#allocation3], %s212_s12 }
  0x45   : > { %s216_s20 = scalar_lea.vmem (!%p960_p4), [#allocation2], %s626_s5  ;;  %p1082_p7 = scmp.ne.s32.totalorder (!%p960_p4), %s1079_s23, 0 }
  0x4a   : > { %792 = dma.done.wait (%p1082_p7), %s213_s7, 256  }
  0x4b   : > { %794 = vsyncadd (%p1082_p7), %s213_s7, 4294967040  ;;  %s222_s6 = scalar_lea.sflag [#allocation5], %s212_s12  ;;  %s225_s25 = scalar_lea.vmem [#allocation4], %s626_s5 }
  0x4c   : > { %796 = dma.done.wait (%p1082_p7), %s222_s6, 256  }
  0x4d   : > { %798 = vsyncadd (%p1082_p7), %s222_s6, 4294967040  ;;  %v1015_v0 = vld [vmem:[%s225_s25] sm:$0xff]  ;;  %s827_s29 = smov 112   ;;  %v1018_v2 = vld [vmem:[%s225_s25 + $0x8] sm:$0xff]  ;;  %s828_s4 = smov 96   ;;  %vm348_vm0 = vcmask 64512  }
  0x4e   : > { %v288_v1 = vld [vmem:[%s216_s20] sm:$0xff]  ;;  %372 = vrot.lane.b32.xlu1 %v1015_v0, %s827_s29  ;;  %v289_v3 = vld [vmem:[%s216_s20 + $0x8] sm:$0xff]  ;;  %s829_s23 = smov 80   ;;  %s830_s8 = smov 64   ;;  %vm355_vm1 = vcmask 130112   ;;  %vm362_vm2 = vcmask 7168  }
  0x4f   : > { %292 = vrot.lane.b32.xlu0 %v288_v1, %s827_s29  ;;  %s831_s11 = smov 48   ;;  %s832_s18 = smov 32   ;;  %vm365_vm3 = vcmask 15360  }
  0x50   : > { %s833_s30 = smov 16   ;;  %p269_p9 = scmp.lt.s32.totalorder %s813_s15, 2 }
  0x52   : > { %374 = vrot.lane.b32.xlu1 %v1018_v2, %s827_s29  ;;  %s1091_s15 = smov (!%p269_p9, %s813_s15), 2 }
  0x53   : > { %294 = vrot.lane.b32.xlu0 %v289_v3, %s827_s29  ;;  %s636_s26 = sshll.u32 %s1091_s15, 4 }
  0x54   : > { %s276_s27 = scalar_lea.vmem %s1075_s2, %s636_s26  ;;  %s286_s10 = scalar_lea.vmem %s1076_s3, %s636_s26 }
  0x56   : > { %302 = vrot.lane.b32.xlu1 %v289_v3, %s828_s4 }
  0x57   : > { %300 = vrot.lane.b32.xlu0 %v288_v1, %s828_s4 }
  0x5a   : > { %382 = vrot.lane.b32.xlu1 %v1018_v2, %s828_s4 }
  0x5b   : > { %380 = vrot.lane.b32.xlu0 %v1015_v0, %s828_s4 }
  0x5e   : > { %310 = vrot.lane.b32.xlu1 %v289_v3, %s829_s23 }
  0x5f   : > { %308 = vrot.lane.b32.xlu0 %v288_v1, %s829_s23 }
  0x62   : > { %390 = vrot.lane.b32.xlu1 %v1018_v2, %s829_s23 }
  0x63   : > { %388 = vrot.lane.b32.xlu0 %v1015_v0, %s829_s23 }
  0x66   : > { %318 = vrot.lane.b32.xlu1 %v289_v3, %s830_s8 }
  0x67   : > { %316 = vrot.lane.b32.xlu0 %v288_v1, %s830_s8 }
  0x6a   : > { %398 = vrot.lane.b32.xlu1 %v1018_v2, %s830_s8 }
  0x6b   : > { %396 = vrot.lane.b32.xlu0 %v1015_v0, %s830_s8 }
  0x6e   : > { %326 = vrot.lane.b32.xlu1 %v289_v3, %s831_s11 }
  0x6f   : > { %324 = vrot.lane.b32.xlu0 %v288_v1, %s831_s11 }
  0x72   : > { %406 = vrot.lane.b32.xlu1 %v1018_v2, %s831_s11 }
  0x73   : > { %404 = vrot.lane.b32.xlu0 %v1015_v0, %s831_s11 }
  0x76   : > { %334 = vrot.lane.b32.xlu1 %v289_v3, %s832_s18 }
  0x77   : > { %332 = vrot.lane.b32.xlu0 %v288_v1, %s832_s18 }
  0x7a   : > { %414 = vrot.lane.b32.xlu1 %v1018_v2, %s832_s18 }
  0x7b   : > { %412 = vrot.lane.b32.xlu0 %v1015_v0, %s832_s18 }
  0x7e   : > { %342 = vrot.lane.b32.xlu1 %v289_v3, %s833_s30 }
  0x7f   : > { %340 = vrot.lane.b32.xlu0 %v288_v1, %s833_s30 }
  0x82   : > { %422 = vrot.lane.b32.xlu1 %v1018_v2, %s833_s30 }
  0x83   : > { %420 = vrot.lane.b32.xlu0 %v1015_v0, %s833_s30 }
  0xc0   : > { %v373_v4 = vpop.permute.xlu1 %372 }
  0xc1   : > { %v293_v5 = vpop.permute.xlu0 %292  ;;  %v378_v30 = vmax.f32 %v1015_v0, %v373_v4 }
  0xc2   : > { %v298_v24 = vmax.f32 %v288_v1, %v293_v5 }
  0xc4   : > { %v375_v6 = vpop.permute.xlu1 %374 }
  0xc5   : > { %v295_v7 = vpop.permute.xlu0 %294  ;;  %v379_v38 = vmax.f32 %v1018_v2, %v375_v6 }
  0xc6   : > { %v299_v25 = vmax.f32 %v289_v3, %v295_v7 }
  0xc8   : > { %v303_v8 = vpop.permute.xlu1 %302 }
  0xc9   : > { %v301_v9 = vpop.permute.xlu0 %300  ;;  %v307_v26 = vmax.f32 %v299_v25, %v303_v8 }
  0xca   : > { %v306_v27 = vmax.f32 %v298_v24, %v301_v9 }
  0xcc   : > { %v383_v10 = vpop.permute.xlu1 %382 }
  0xcd   : > { %v381_v11 = vpop.permute.xlu0 %380  ;;  %v387_v47 = vmax.f32 %v379_v38, %v383_v10 }
  0xce   : > { %v386_v33 = vmax.f32 %v378_v30, %v381_v11 }
  0xd0   : > { %v311_v12 = vpop.permute.xlu1 %310 }
  0xd1   : > { %v309_v13 = vpop.permute.xlu0 %308  ;;  %v315_v31 = vmax.f32 %v307_v26, %v311_v12 }
  0xd2   : > { %v314_v32 = vmax.f32 %v306_v27, %v309_v13 }
  0xd4   : > { %v391_v14 = vpop.permute.xlu1 %390 }
  0xd5   : > { %v389_v15 = vpop.permute.xlu0 %388  ;;  %v395_v51 = vmax.f32 %v387_v47, %v391_v14 }
  0xd6   : > { %v394_v39 = vmax.f32 %v386_v33, %v389_v15 }
  0xd8   : > { %v319_v16 = vpop.permute.xlu1 %318 }
  0xd9   : > { %v317_v17 = vpop.permute.xlu0 %316  ;;  %v323_v34 = vmax.f32 %v315_v31, %v319_v16 }
  0xda   : > { %v322_v35 = vmax.f32 %v314_v32, %v317_v17 }
  0xdc   : > { %v399_v18 = vpop.permute.xlu1 %398 }
  0xdd   : > { %v397_v19 = vpop.permute.xlu0 %396  ;;  %v403_v56 = vmax.f32 %v395_v51, %v399_v18 }
  0xde   : > { %v402_v42 = vmax.f32 %v394_v39, %v397_v19 }
  0xe0   : > { %v327_v20 = vpop.permute.xlu1 %326 }
  0xe1   : > { %v325_v21 = vpop.permute.xlu0 %324  ;;  %v331_v40 = vmax.f32 %v323_v34, %v327_v20 }
  0xe2   : > { %v330_v41 = vmax.f32 %v322_v35, %v325_v21 }
  0xe4   : > { %v407_v22 = vpop.permute.xlu1 %406 }
  0xe5   : > { %v405_v23 = vpop.permute.xlu0 %404  ;;  %v411_v58 = vmax.f32 %v403_v56, %v407_v22 }
  0xe6   : > { %v410_v48 = vmax.f32 %v402_v42, %v405_v23 }
  0xe8   : > { %v335_v28 = vpop.permute.xlu1 %334 }
  0xe9   : > { %v333_v29 = vpop.permute.xlu0 %332  ;;  %v339_v43 = vmax.f32 %v331_v40, %v335_v28 }
  0xea   : > { %v338_v44 = vmax.f32 %v330_v41, %v333_v29 }
  0xec   : > { %v415_v36 = vpop.permute.xlu1 %414 }
  0xed   : > { %v413_v37 = vpop.permute.xlu0 %412  ;;  %v419_v62 = vmax.f32 %v411_v58, %v415_v36 }
  0xee   : > { %v418_v52 = vmax.f32 %v410_v48, %v413_v37 }
  0xf0   : > { %v343_v45 = vpop.permute.xlu1 %342 }
  0xf1   : > { %v341_v46 = vpop.permute.xlu0 %340  ;;  %v347_v49 = vmax.f32 %v339_v43, %v343_v45 }
  0xf2   : > { %v346_v50 = vmax.f32 %v338_v44, %v341_v46 }
  0xf3   : > { %v352_v53 = vsel %vm348_vm0, %v347_v49, -inf  ;;  %v359_v0 = vsel %vm355_vm1, %v347_v49, -inf }
  0xf4   : > { %v349_v54 = vsel %vm348_vm0, %v346_v50, -inf  ;;  %353 = vmax.xlane.f32.xlu1 %v352_v53  ;;  %v356_v59 = vsel %vm355_vm1, %v346_v50, -inf  ;;  %v423_v61 = vpop.permute.xlu1 %422 }
  0xf5   : > { %350 = vmax.xlane.f32.xlu0 %v349_v54  ;;  %v421_v55 = vpop.permute.xlu0 %420  ;;  %v427_v63 = vmax.f32 %v419_v62, %v423_v61 }
  0xf6   : > { %v426_v57 = vmax.f32 %v418_v52, %v421_v55 }
  0xf7   : > { %v431_v2 = vsel %vm348_vm0, %v427_v63, -inf  ;;  %v437_v3 = vsel %vm355_vm1, %v427_v63, -inf }
  0xf8   : > { %v428_v60 = vsel %vm348_vm0, %v426_v57, -inf  ;;  %v434_v1 = vsel %vm355_vm1, %v426_v57, -inf }
  0xf9   : > { %357 = vmax.xlane.f32.xlu0 %v356_v59  ;;  %429 = vmax.xlane.f32.xlu1 %v428_v60 }
  0xfd   : > { %360 = vmax.xlane.f32.xlu0 %v359_v0  ;;  %435 = vmax.xlane.f32.xlu1 %v434_v1 }
 0x101   : > { %432 = vmax.xlane.f32.xlu0 %v431_v2 }
 0x105   : > { %438 = vmax.xlane.f32.xlu0 %v437_v3 }
 0x181   : > { %v354_v4 = vpop.xlane.xlu1 %353 }
 0x182   : > { %v351_v5 = vpop.xlane.xlu0 %350 }
 0x186   : > { %v430_v6 = vpop.xlane.xlu1 %429  ;;  %v358_v7 = vpop.xlane.xlu0 %357 }
 0x187   : > { %v363_v8 = vsel %vm362_vm2, %v351_v5, %v358_v7 }
 0x188   : > { %366 = vst.msk [vmem:[%s276_s27] sm:$0xff] %vm365_vm3, %v363_v8 }
 0x18a   : > { %v436_v9 = vpop.xlane.xlu1 %435  ;;  %v361_v10 = vpop.xlane.xlu0 %360 }
 0x18b   : > { %v440_v11 = vsel %vm362_vm2, %v430_v6, %v436_v9  ;;  %v364_v12 = vsel %vm362_vm2, %v354_v4, %v361_v10 }
 0x18c   : > { %442 = vst.msk [vmem:[%s286_s10] sm:$0xff] %vm365_vm3, %v440_v11  ;;  %367 = vst.msk [vmem:[%s276_s27 + $0x8] sm:$0xff] %vm365_vm3, %v364_v12 }
 0x18e   : > { %v433_v13 = vpop.xlane.xlu0 %432 }
 0x192   : > { %v439_v14 = vpop.xlane.xlu0 %438 }
 0x193   : > { %v441_v15 = vsel %vm362_vm2, %v433_v13, %v439_v14 }
 0x194   : > { %443 = vst.msk [vmem:[%s286_s10 + $0x8] sm:$0xff] %vm365_vm3, %v441_v15 }
 0x195 PF: > { %s20_s17 = sadd.s32 1, %s821_s17   ;;  %s1083_s12 = smov %s805_s13 }
 0x196   : > { %p17_p11 = scmp.ge.s32.totalorder %s20_s17, 5   ;;  %s1084_s13 = smov %s809_s14 }
 0x197   : > { %s1085_s14 = smov %s903_s24  ;;  %s1086_s15 = smov %s817_s16 }
 0x198   : > { %s1087_s16 = smov %s1089_s19  ;;  %19 = sbr.rel (!%p17_p11) target bundleno = 6 (0x6), region = 93 }
 0x19f   :  { %499 = vsyncpa [#allocation3], 1 }
 0x1a0   :  { %501 = vsyncpa [#allocation3 + $0x1], 1 }
 0x1a1   :  { %502 = vsyncpa [#allocation5], 1 }
 0x1a2   :  { %504 = vsyncpa [#allocation5 + $0x1], 1 }

</bundles_post_ra>
